<compile_context>
chip_gen: v7x
topology: tpu7x:2x2x1
jax: 0.10.0
libtpu: 0.0.40
codegen_flags: <defaults>
</compile_context>

<pallas_src>
import math

import jax
import jax.numpy as jnp
from jax.experimental import pallas as pl
from jax.experimental.pallas import tpu as pltpu


def _round_up(n: int, m: int) -> int:
    return ((n + m - 1) // m) * m


def _sublane_multiple(dtype) -> int:
    # Min second-to-last tile dim per dtype: f32 -> 8, bf16 -> 16, int8/fp8 -> 32.
    return {4: 8, 2: 16, 1: 32}.get(jnp.dtype(dtype).itemsize, 8)


def _gelu_tanh(x):
    # TODO(synk): torch.nn.GELU() defaults to the exact erf formulation; the
    # tanh approximation (max abs deviation ~3e-4) is used here because it
    # lowers cleanly to VPU+EUP ops on all Mosaic versions.
    c = 0.7978845608028654  # sqrt(2/pi)
    return 0.5 * x * (1.0 + jnp.tanh(c * (x + 0.044715 * (x * x * x))))


def _make_res_mlp_kernel(th: int, n_chunks: int):
    def kernel(x_ref, w1_ref, b1_ref, w2_ref, b2_ref, o_ref):
        # x_ref: (tm, D) f32     w1_ref: (D, H) bf16   b1_ref: (1, H) f32
        # w2_ref: (H, D) bf16    b2_ref: (1, D) f32    o_ref:  (tm, D) f32
        x = x_ref[...]
        x_mxu = x.astype(w1_ref.dtype)          # bf16 operand for the MXU
        tm = x_ref.shape[0]
        D = o_ref.shape[1]

        acc = jnp.zeros((tm, D), jnp.float32)
        # Chunk the hidden dim so the live f32 (tm, th) GELU intermediates
        # stay bounded when tm is large (static slices -> zero-cost views).
        for c in range(n_chunks):
            lo, hi = c * th, (c + 1) * th
            h = jnp.dot(x_mxu, w1_ref[:, lo:hi],
                        preferred_element_type=jnp.float32)
            h = _gelu_tanh(h + b1_ref[:, lo:hi])
            acc = acc + jnp.dot(h.astype(w2_ref.dtype), w2_ref[lo:hi, :],
                                preferred_element_type=jnp.float32)

        y = acc + b2_ref[...] + x.astype(jnp.float32)
        o_ref[...] = y.astype(o_ref.dtype)

    return kernel


def res_mlp_block(x, w1, b1, w2, b2, *, max_row_tile=512, target_steps=8,
                  mxu_dtype=jnp.bfloat16):
    """Fused ResMlpBlock forward.

    x: (..., D); w1: (D, H); b1: (H,); w2: (H, D); b2: (D,).
    Returns an array with the same shape/dtype as x.
    """
    orig_shape = x.shape
    D = orig_shape[-1]
    H = w1.shape[1]
    assert w1.shape == (D, H), (w1.shape, D, H)
    assert w2.shape == (H, D), (w2.shape, H, D)

    x2 = x.reshape(-1, D)
    M = x2.shape[0]

    # bf16 MXU operands; biases kept f32 (bias/GELU/residual stay f32 in-kernel).
    w1_m = w1.astype(mxu_dtype)
    w2_m = w2.astype(mxu_dtype)
    b1_2 = b1.reshape(1, H).astype(jnp.float32)
    b2_2 = b2.reshape(1, D).astype(jnp.float32)

    # Row tile: as large as max_row_tile, but small enough that the parallel
    # grid has ~target_steps iterations (>= 4 per v7x TensorCore); rounded to
    # the dtype-specific sublane multiple.
    sub = _sublane_multiple(x.dtype)
    tm = _round_up(pl.cdiv(M, target_steps), sub)
    tm = max(sub, min(max_row_tile, tm))
    grid = (pl.cdiv(M, tm),)          # partial last block is masked by Pallas

    # Hidden chunk size: keep H whole when small, else a lane-dense divisor.
    th = H
    if H > 512:
        for cand in (512, 384, 256, 128):
            if H % cand == 0:
                th = cand
                break
    n_chunks = H // th

    x_it = jnp.dtype(x.dtype).itemsize
    w_it = jnp.dtype(mxu_dtype).itemsize

    flops = 4 * M * D * H                              # two matmuls
    bytes_accessed = (2 * M * D * x_it                 # x read + out write
                      + (D * H + H * D) * w_it         # bf16 weights
                      + (H + D) * 4)                   # f32 biases
    cost = pl.CostEstimate(flops=flops, transcendentals=M * H,
                           bytes_accessed=bytes_accessed)

    # Per-step VMEM residency (per-operand itemsizes; weights counted 2x to be
    # conservative about buffering even though their index_map is constant).
    vmem_needed = (2 * tm * D * x_it                   # double-buffered x tiles
                   + 2 * tm * D * x_it                 # double-buffered out tiles
                   + 2 * (D * H + H * D) * w_it        # resident bf16 weights
                   + 2 * (H + D) * 4                   # resident f32 biases
                   + 4 * tm * th * 4                   # h chunk + GELU temps (f32)
                   + tm * D * 4                        # f32 accumulator
                   + tm * D * w_it)                    # bf16 copy of x tile
    vmem_limit = int(min(40 * 1024 * 1024,
                         max(2 * vmem_needed, 8 * 1024 * 1024)))

    out = pl.pallas_call(
        _make_res_mlp_kernel(th, n_chunks),
        out_shape=jax.ShapeDtypeStruct((M, D), x.dtype),
        grid_spec=pltpu.PrefetchScalarGridSpec(
            num_scalar_prefetch=0,
            grid=grid,
            in_specs=[
                pl.BlockSpec((tm, D), lambda i: (i, 0)),   # x row tile (streamed)
                pl.BlockSpec((D, H), lambda i: (0, 0)),    # W1 (VMEM-resident)
                pl.BlockSpec((1, H), lambda i: (0, 0)),    # b1 (VMEM-resident)
                pl.BlockSpec((H, D), lambda i: (0, 0)),    # W2 (VMEM-resident)
                pl.BlockSpec((1, D), lambda i: (0, 0)),    # b2 (VMEM-resident)
            ],
            out_specs=pl.BlockSpec((tm, D), lambda i: (i, 0)),
        ),
        compiler_params=pltpu.CompilerParams(
            dimension_semantics=("parallel",),
            vmem_limit_bytes=vmem_limit,
        ),
        cost_estimate=cost,
    )(x2, w1_m, b1_2, w2_m, b2_2)

    return out.reshape(orig_shape)


def _res_mlp_ref(x, w1, b1, w2, b2):
    hp = jax.lax.Precision.HIGHEST
    h = _gelu_tanh(jnp.matmul(x, w1, precision=hp) + b1.reshape(1, -1))
    y = jnp.matmul(h, w2, precision=hp) + b2.reshape(1, -1)
    return y + x


if __name__ == "__main__":
    input_dim = 128                      # D (lane-dense: multiple of 128)
    hidden_dim = 2 * input_dim           # default hidden_layers_ratio=[2]
    batch, seq = 2, 128                  # flattened M = 256 rows -> 8 grid steps

    dtype = jnp.float32
    key = jax.random.PRNGKey(0)
    kx, k1, k2, k3, k4, k5 = jax.random.split(key, 6)

    # nn.Linear-style init (uniform +-1/sqrt(fan_in)); last-layer weight *= 0.0
    # exactly as in the PyTorch module.
    lim1 = 1.0 / math.sqrt(input_dim)
    lim2 = 1.0 / math.sqrt(hidden_dim)
    w1 = jax.random.uniform(k1, (input_dim, hidden_dim), dtype, -lim1, lim1)
    b1 = jax.random.uniform(k2, (hidden_dim,), dtype, -lim1, lim1)
    w2 = jax.random.uniform(k3, (hidden_dim, input_dim), dtype, -lim2, lim2) * 0.0
    b2 = jax.random.uniform(k4, (input_dim,), dtype, -lim2, lim2)

    x = jax.random.normal(kx, (batch, seq, input_dim), dtype)

    # Tolerances account for bf16 MXU operands (f32 reference).
    atol = rtol = 1e-2

    # Module-faithful parameters (W2 zero-initialized).
    out = jax.block_until_ready(res_mlp_block(x, w1, b1, w2, b2))
    ref = _res_mlp_ref(x, w1, b1, w2, b2)
    assert out.shape == x.shape, out.shape
    assert jnp.allclose(out, ref, atol=atol, rtol=rtol), \
        float(jnp.max(jnp.abs(out - ref)))

    # Non-zero W2 so both matmuls are numerically exercised.
    w2_nz = 0.05 * jax.random.normal(k5, (hidden_dim, input_dim), dtype)
    out_nz = jax.block_until_ready(res_mlp_block(x, w1, b1, w2_nz, b2))
    ref_nz = _res_mlp_ref(x, w1, b1, w2_nz, b2)
    assert jnp.allclose(out_nz, ref_nz, atol=atol, rtol=rtol), \
        float(jnp.max(jnp.abs(out_nz - ref_nz)))

    # Ragged row count (M=30): exercises the masked partial last block, no pad.
    x_odd = jax.random.normal(kx, (3, 10, input_dim), dtype)
    out_odd = jax.block_until_ready(res_mlp_block(x_odd, w1, b1, w2_nz, b2))
    ref_odd = _res_mlp_ref(x_odd, w1, b1, w2_nz, b2)
    assert out_odd.shape == x_odd.shape
    assert jnp.allclose(out_odd, ref_odd, atol=atol, rtol=rtol), \
        float(jnp.max(jnp.abs(out_odd - ref_odd)))

    print("KERNEL_OK")
</pallas_src>

<mosaic_0001>
module attributes {stable_mosaic.version = 11 : i64} {
  func.func @kernel(%arg0: i32, %arg1: memref<32x128xf32, #tpu.memory_space<vmem>>, %arg2: memref<128x256xbf16, #tpu.memory_space<vmem>>, %arg3: memref<1x256xf32, #tpu.memory_space<vmem>>, %arg4: memref<256x128xbf16, #tpu.memory_space<vmem>>, %arg5: memref<1x128xf32, #tpu.memory_space<vmem>>, %arg6: memref<32x128xf32, #tpu.memory_space<vmem>>) attributes {dimension_semantics = [#tpu.dimension_semantics<parallel>], iteration_bounds = array<i64: 8>, scalar_prefetch = 0 : i64, scratch_operands = 0 : i64, tpu.core_type = #tpu.core_type<tc>, window_params = [{transform_indices = @transform_0, window_bounds = array<i64: 32, 128>}, {pipeline_mode = #tpu.pipeline_mode<synchronous>, transform_indices = @transform_1, window_bounds = array<i64: 128, 256>}, {pipeline_mode = #tpu.pipeline_mode<synchronous>, transform_indices = @transform_2, window_bounds = array<i64: 1, 256>}, {pipeline_mode = #tpu.pipeline_mode<synchronous>, transform_indices = @transform_3, window_bounds = array<i64: 256, 128>}, {pipeline_mode = #tpu.pipeline_mode<synchronous>, transform_indices = @transform_4, window_bounds = array<i64: 1, 128>}, {transform_indices = @transform_5, window_bounds = array<i64: 32, 128>}]} {
    %c0 = arith.constant 0 : index
    %c0_0 = arith.constant 0 : index
    %0 = vector.load %arg1[%c0, %c0_0] : memref<32x128xf32, #tpu.memory_space<vmem>>, vector<32x128xf32>
    %1 = arith.truncf %0 : vector<32x128xf32> to vector<32x128xbf16>
    %cst = arith.constant 0.000000e+00 : f32
    %2 = vector.broadcast %cst : f32 to vector<32x128xf32>
    %c0_1 = arith.constant 0 : index
    %c0_2 = arith.constant 0 : index
    %3 = vector.load %arg2[%c0_1, %c0_2] : memref<128x256xbf16, #tpu.memory_space<vmem>>, vector<128x256xbf16>
    %cst_3 = arith.constant dense<0.000000e+00> : vector<32x256xf32>
    %4 = tpu.matmul %1, %3, %cst_3 {dimension_numbers = #tpu.dot_dimension_numbers<[1], [0], [0], [1], [0, 0, 1, 1], [], []>} : vector<32x128xbf16>, vector<128x256xbf16>, vector<32x256xf32> -> vector<32x256xf32>
    %c0_4 = arith.constant 0 : index
    %c0_5 = arith.constant 0 : index
    %5 = vector.load %arg3[%c0_4, %c0_5] : memref<1x256xf32, #tpu.memory_space<vmem>>, vector<1x256xf32>
    %6 = vector.broadcast %5 : vector<1x256xf32> to vector<32x256xf32>
    %7 = arith.addf %4, %6 : vector<32x256xf32>
    %cst_6 = arith.constant 5.000000e-01 : f32
    %8 = vector.broadcast %cst_6 : f32 to vector<32x256xf32>
    %9 = arith.mulf %8, %7 : vector<32x256xf32>
    %10 = arith.mulf %7, %7 : vector<32x256xf32>
    %11 = arith.mulf %10, %7 : vector<32x256xf32>
    %cst_7 = arith.constant 4.471500e-02 : f32
    %12 = vector.broadcast %cst_7 : f32 to vector<32x256xf32>
    %13 = arith.mulf %12, %11 : vector<32x256xf32>
    %14 = arith.addf %7, %13 : vector<32x256xf32>
    %cst_8 = arith.constant 0.797884583 : f32
    %15 = vector.broadcast %cst_8 : f32 to vector<32x256xf32>
    %16 = arith.mulf %15, %14 : vector<32x256xf32>
    %17 = math.tanh %16 : vector<32x256xf32>
    %cst_9 = arith.constant 1.000000e+00 : f32
    %18 = vector.broadcast %cst_9 : f32 to vector<32x256xf32>
    %19 = arith.addf %18, %17 : vector<32x256xf32>
    %20 = arith.mulf %9, %19 : vector<32x256xf32>
    %21 = arith.truncf %20 : vector<32x256xf32> to vector<32x256xbf16>
    %c0_10 = arith.constant 0 : index
    %c0_11 = arith.constant 0 : index
    %22 = vector.load %arg4[%c0_10, %c0_11] : memref<256x128xbf16, #tpu.memory_space<vmem>>, vector<256x128xbf16>
    %cst_12 = arith.constant dense<0.000000e+00> : vector<32x128xf32>
    %23 = tpu.matmul %21, %22, %cst_12 {dimension_numbers = #tpu.dot_dimension_numbers<[1], [0], [0], [1], [0, 0, 1, 1], [], []>} : vector<32x256xbf16>, vector<256x128xbf16>, vector<32x128xf32> -> vector<32x128xf32>
    %24 = arith.addf %2, %23 : vector<32x128xf32>
    %c0_13 = arith.constant 0 : index
    %c0_14 = arith.constant 0 : index
    %25 = vector.load %arg5[%c0_13, %c0_14] : memref<1x128xf32, #tpu.memory_space<vmem>>, vector<1x128xf32>
    %26 = vector.broadcast %25 : vector<1x128xf32> to vector<32x128xf32>
    %27 = arith.addf %24, %26 : vector<32x128xf32>
    %28 = arith.addf %27, %0 : vector<32x128xf32>
    %c0_15 = arith.constant 0 : index
    %c0_16 = arith.constant 0 : index
    %29 = vector.load %arg6[%c0_15, %c0_16] : memref<32x128xf32, #tpu.memory_space<vmem>>, vector<32x128xf32>
    tpu.vector_store %arg6[%c0_15, %c0_16], %28 {strides = array<i32>} : memref<32x128xf32, #tpu.memory_space<vmem>>, vector<32x128xf32>,
    return
  }
  func.func @transform_0(%arg0: i32) -> (i32, i32) {
    %c0_i32 = arith.constant 0 : i32
    %c0_i32_0 = arith.constant 0 : i32
    return %arg0, %c0_i32 : i32, i32
  }
  func.func @transform_1(%arg0: i32) -> (i32, i32) {
    %c0_i32 = arith.constant 0 : i32
    %c0_i32_0 = arith.constant 0 : i32
    %c0_i32_1 = arith.constant 0 : i32
    return %c0_i32, %c0_i32_0 : i32, i32
  }
  func.func @transform_2(%arg0: i32) -> (i32, i32) {
    %c0_i32 = arith.constant 0 : i32
    %c0_i32_0 = arith.constant 0 : i32
    %c0_i32_1 = arith.constant 0 : i32
    return %c0_i32, %c0_i32_0 : i32, i32
  }
  func.func @transform_3(%arg0: i32) -> (i32, i32) {
    %c0_i32 = arith.constant 0 : i32
    %c0_i32_0 = arith.constant 0 : i32
    %c0_i32_1 = arith.constant 0 : i32
    return %c0_i32, %c0_i32_0 : i32, i32
  }
  func.func @transform_4(%arg0: i32) -> (i32, i32) {
    %c0_i32 = arith.constant 0 : i32
    %c0_i32_0 = arith.constant 0 : i32
    %c0_i32_1 = arith.constant 0 : i32
    return %c0_i32, %c0_i32_0 : i32, i32
  }
  func.func @transform_5(%arg0: i32) -> (i32, i32) {
    %c0_i32 = arith.constant 0 : i32
    %c0_i32_0 = arith.constant 0 : i32
    return %arg0, %c0_i32 : i32, i32
  }
}

</mosaic_0001>

<bundles_post_ra>
// kernel: tpu_custom_call.1
= control target key start
LH: loop header
LB: loop body
LE: loop exit
PB: predicated region body
PF: predicated region fallthrough
CT: control target
= control target key end

     0   :  { %10 = vsyncpa [#allocation3], 0  ;;  %s1531_s0 = inlined_call_operand.hbm [shape: f32[256,128], index: 0, kind: input, shape index: {}]   ;;  %s1532_s1 = inlined_call_operand.hbm [shape: bf16[128,256], index: 1, kind: input, shape index: {}]   ;;  %s1533_s2 = inlined_call_operand.vmem [shape: f32[1,256], index: 2, kind: input, shape index: {}]   ;;  %s1534_s3 = inlined_call_operand.hbm [shape: bf16[256,128], index: 3, kind: input, shape index: {}]   ;;  %s1535_s4 = inlined_call_operand.vmem [shape: f32[1,128], index: 4, kind: input, shape index: {}]   ;;  %s1536_s5 = inlined_call_operand.hbm [shape: f32[256,128], index: 5, kind: output, shape index: {}]  }
   0x1   :  { %12 = vsyncpa [#allocation3 + $0x1], 0 }
   0x2   :  { %13 = vsyncpa [#allocation6], 0 }
   0x3   :  { %14 = vsyncpa [#allocation4], 0 }
   0x4   :  { %16 = vsyncpa [#allocation4 + $0x1], 0  ;;  %s1226_s18 = smov 0   ;;  %s1228_s19 = smov 0  }
   0x5   :  { %s1230_s20 = smov 0   ;;  %s1232_s21 = smov 0  }
   0x6 LB: > { %s1247_s22 = sadd.s32 4294967295, %s1183_s21   ;;  %s816_s23 = sadd.s32 4294967294, %s1183_s21   ;;  %s1183_s21 = sphi %s1232_s21, %s1555_s21   ;;  %s1179_s20 = sphi %s1230_s20, %s1554_s20   ;;  %s1175_s19 = sphi %s1228_s19, %s1553_s19   ;;  %s1171_s18 = sphi %s1226_s18, %s1552_s18  }
   0x7   : > { %p42_p0 = scmp.ne.s32.totalorder %s1175_s19, %s1171_s18  ;;  %p1537_p1 = scmp.eq.s32.totalorder %s1247_s22, 0 }
   0x8   : > { %p156_p3 = scmp.eq.s32.totalorder %s816_s23, 7  ;;  %p817_p5 = scmp.ge.s32.totalorder %s1183_s21, 1 }
   0x9   : > { %p1256_p4 = por %p1537_p1, %p42_p0  ;;  %p163_p7 = scmp.lt.s32.totalorder %s1183_s21, 9 }
   0xa   : > { %p1261_p6 = por %p156_p3, %p42_p0  ;;  %s1185_s27 = smov [#allocation5]  }
   0xb   : > { %s1540_s24 = scalar_select %p1256_p4, 1, 0 }
   0xc   : > { %s1541_s25 = scalar_select %p1261_p6, 1, 0 }
   0xd   : > { %p1266_p8 = pnand %p817_p5, %p163_p7  ;;  %s175_s28 = sshll.u32 %s1185_s27, 4  ;;  %s176_s28 = int_to_ptr.vmem [resolvable:$true] %s175_s28 }
   0xe   : > { %s1186_s30 = smov [#allocation7]   ;;  %s1027_s9 = scalar_lea.hbm %s1532_s1, 2048 }
   0xf   : > { %s1542_s26 = scalar_select %p1266_p8, 1, 0 }
  0x10   : > { %p909_p9 = pneg %p1266_p8  ;;  %s191_s6 = sshll.u32 %s1186_s30, 4  ;;  %s1278_s6 = int_to_ptr.vmem [resolvable:$true] %s191_s6 }
  0x11   : > { %p1028_p11 = scmp.ne.s32.totalorder %s1532_s1, %s1027_s9  ;;  %p1034_p3 = scmp.lt.u32.totalorder %s1027_s9, %s1532_s1 }
  0x12   : > { %p1274_p10 = pnand %p909_p9, %p1537_p1 }
  0x14   : > { %p1029_p12 = pneg %p1274_p10 }
  0x16   : > { %p1030_p13 = pnand %p1029_p12, %p1028_p11 }
  0x18   : > { %p1031_p0 = pneg %p1030_p13 }
  0x1a   : > { %p1036_p5 = pnand %p1034_p3, %p1031_p0 }
  0x1c   : > { %1039 = shalt.err (!%p1036_p5)
}
  0x1d   : > { %s1040_s14 = scalar_lea.vmem %s176_s28, 2048  ;;  %p1048_p2 = scmp.lt.s32.totalorder %s176_s28, %s176_s28 }
  0x1e   : > { %p1041_p7 = scmp.ne.s32.totalorder %s176_s28, %s1040_s14  ;;  %p1049_p6 = scmp.lt.s32.totalorder %s1040_s14, %s1040_s14 }
  0x20   : > { %p1043_p9 = pnand %p1041_p7, %p1029_p12  ;;  %p1050_p4 = por %p1049_p6, %p1048_p2 }
  0x22   : > { %p1044_p1 = pneg %p1043_p9 }
  0x24   : > { %p1051_p8 = pnand %p1050_p4, %p1044_p1 }
  0x26   : > { %1054 = shalt.err (!%p1051_p8)
}
  0x27   : > { %s1187_s15 = smov 128   ;;  %s1188_s16 = smov 8  }
  0x28   : > { %912 = dma.hbm_to_vmem [thread:$0]  (!%p1274_p10), %s1532_s1, 2048, %s176_s28, [#allocation6], %s1187_s15, %s1187_s15, %s1188_s16  }
  0x29   : > { %s1055_s7 = scalar_lea.hbm %s1534_s3, 2048 }
  0x2a   : > { %p1056_p1 = scmp.ne.s32.totalorder %s1534_s3, %s1055_s7  ;;  %p1062_p6 = scmp.lt.u32.totalorder %s1055_s7, %s1534_s3 }
  0x2c   : > { %p1058_p2 = pnand %p1056_p1, %p1029_p12 }
  0x2e   : > { %p1059_p4 = pneg %p1058_p2 }
  0x30   : > { %p1064_p8 = pnand %p1062_p6, %p1059_p4 }
  0x32   : > { %1067 = shalt.err (!%p1064_p8)
}
  0x33   : > { %s1068_s28 = scalar_lea.vmem %s1278_s6, 2048  ;;  %p1076_p3 = scmp.lt.s32.totalorder %s1278_s6, %s1278_s6 }
  0x34   : > { %p1069_p11 = scmp.ne.s32.totalorder %s1278_s6, %s1068_s28  ;;  %p1077_p5 = scmp.lt.s32.totalorder %s1068_s28, %s1068_s28 }
  0x36   : > { %p1071_p13 = pnand %p1069_p11, %p1029_p12  ;;  %p1078_p7 = por %p1077_p5, %p1076_p3 }
  0x38   : > { %p1072_p0 = pneg %p1071_p13 }
  0x3a   : > { %p1079_p9 = pnand %p1078_p7, %p1072_p0 }
  0x3c   : > { %1082 = shalt.err (!%p1079_p9)
}
  0x3d   : > { %s1189_s12 = smov 64   ;;  %s1190_s13 = smov 4  }
  0x3e   : > { %915 = dma.hbm_to_vmem [thread:$0]  (!%p1274_p10), %s1534_s3, 2048, %s1278_s6, [#allocation6], %s1189_s12, %s1189_s12, %s1190_s13  }
  0x3f   : > { %s1331_s23 = sadd.s32 1, %s1183_s21   ;;  %s29_s30 = sadd.s32 1, %s1179_s20 }
  0x40   : > { %s26_s27 = ssub.s32 %s1183_s21, %s1331_s23  ;;  %p36_p1 = scmp.ne.s32.totalorder %s1179_s20, %s1175_s19 }
  0x41   : > { %p27_p12 = scmp.eq.s32.totalorder %s26_s27, 0  ;;  %p37_p2 = scmp.eq.s32.totalorder %s1183_s21, 0 }
  0x42   : > { %p1544_p6 = scmp.eq.s32.totalorder %s1247_s22, 7  ;;  %p926_p11 = scmp.lt.s32.totalorder %s1183_s21, 8 }
  0x43   : > { %s1340_s7 = scalar_select %p27_p12, %s1179_s20, %s29_s30  }
  0x44   : > { %p38_p4 = por %p37_p2, %p36_p1  ;;  %p1344_p8 = por %p1544_p6, %p36_p1 }
  0x45   : > { %s208_s29 = sand.u32 1, %s1179_s20   ;;  %s867_s6 = sshll.u32 %s1183_s21, 9 }
  0x46   : > { %s821_s9 = sshll.u32 %s208_s29, 5  ;;  %s1354_s28 = scalar_lea.hbm %s1531_s0, %s867_s6 }
  0x47   : > { %s212_s12 = scalar_lea.vmem [#allocation2], %s821_s9  ;;  %p1358_p10 = pnand %p926_p11, %p38_p4 }
  0x48   : > { %s219_s13 = sshll.u32 %s212_s12, 4  ;;  %s1362_s17 = scalar_lea.sflag [#allocation3], %s208_s29  ;;  %s1356_s13 = int_to_ptr.vmem [resolvable:$true] %s219_s13 }
  0x49   : > { %s1083_s27 = scalar_lea.hbm %s1354_s28, 512  ;;  %p1085_p0 = pneg %p1358_p10 }
  0x4a   : > { %p1084_p13 = scmp.ne.s32.totalorder %s1354_s28, %s1083_s27  ;;  %s1088_s6 = scalar_lea.hbm %s1531_s0, 4096 }
  0x4b   : > { %p1089_p7 = scmp.lt.u32.totalorder %s1354_s28, %s1531_s0  ;;  %p1090_p9 = scmp.lt.u32.totalorder %s1088_s6, %s1083_s27 }
  0x4c   : > { %p1086_p3 = pnand %p1085_p0, %p1084_p13  ;;  %p1092_p1 = scmp.lt.u32.totalorder %s1083_s27, %s1354_s28 }
  0x4d   : > { %p1091_p12 = por %p1090_p9, %p1089_p7 }
  0x4e   : > { %p1087_p5 = pneg %p1086_p3 }
  0x4f   : > { %p1093_p2 = por %p1092_p1, %p1091_p12 }
  0x51   : > { %p1094_p4 = pnand %p1093_p2, %p1087_p5 }
  0x53   : > { %1097 = shalt.err (!%p1094_p4)
}
  0x54   : > { %s1098_s29 = scalar_lea.vmem %s1356_s13, 512  ;;  %s1191_s12 = smov [#allocation2]  }
  0x55   : > { %p1099_p6 = scmp.ne.s32.totalorder %s1356_s13, %s1098_s29  ;;  %s1103_s30 = sshll.u32 %s1191_s12, 4  ;;  %s1104_s30 = int_to_ptr.vmem [resolvable:$false] %s1103_s30 }
  0x56   : > { %s1105_s9 = scalar_lea.vmem %s1104_s30, 1024  ;;  %p1106_p3 = scmp.lt.s32.totalorder %s1356_s13, %s1104_s30 }
  0x57   : > { %p1101_p11 = pnand %p1099_p6, %p1085_p0  ;;  %p1107_p7 = scmp.lt.s32.totalorder %s1105_s9, %s1098_s29 }
  0x59   : > { %p1102_p13 = pneg %p1101_p11  ;;  %p1108_p9 = por %p1107_p7, %p1106_p3 }
  0x5b   : > { %p1109_p12 = pnand %p1108_p9, %p1102_p13 }
  0x5d   : > { %1112 = shalt.err (!%p1109_p12)
}
  0x5e   : > { %919 = dma.hbm_to_vmem [thread:$0]  (!%p1358_p10), %s1354_s28, 512, %s1356_s13, %s1362_s17, %s1187_s15, %s1187_s15, %s1188_s16  }
  0x5f   : > { %p1547_p0 = scmp.ne.s32.totalorder %s1542_s26, 0 }
  0x60   : > { %s1396_s27 = sand.u32 (!%p1547_p0), 1, %s1175_s19   ;;  %p1548_p5 = scmp.ne.s32.totalorder (!%p1547_p0), %s1540_s24, 0 }
  0x61   : > { %231 = sbr.rel (%p1547_p0) target bundleno = 630 (0x276), region = 40  ;;  %s825_s6 = sshll.u32 (!%p1547_p0), %s1396_s27, 5 }
  0x62   : > { %s234_s10 = scalar_lea.sflag (!%p1547_p0), [#allocation3], %s1396_s27  ;;  %s1402_s14 = scalar_lea.vmem (!%p1547_p0), [#allocation2], %s825_s6 }
  0x68   : > { %1158 = dma.done.wait (%p1548_p5), %s234_s10, 512  }
  0x69   : > { %1160 = vsyncadd (%p1548_p5), %s234_s10, 4294966784  ;;  %p1549_p10 = scmp.eq.s32.totalorder %s1247_s22, 0 }
  0x6b   : > { %1162 = dma.done.wait (%p1549_p10), [#allocation6], 4096   ;;  %p1550_p1 = pmov %p1549_p10 }
  0x6c   : > { %v1192_v0 = vmov 0   ;;  %v971_v1 = vld [vmem:[#allocation5 + $0x4] ss:$8 sps:$4 sm:$0xff]   ;;  %v973_v2 = vld [vmem:[#allocation5] ss:$8 sps:$4 sm:$0xff]   ;;  %v1421_v20 = vld [vmem:[%s1402_s14 + $0x10] sm:$0xff]  ;;  %v299_v39 = vlaneseq }
  0x6d   : > { %1164 = vsyncadd (%p1550_p1), [#allocation6], 4294963200  ;;  %421 = vmatprep.mubr.bf16.mxu0 %v1192_v0  ;;  %389 = vmatprep.subr.bf16.mxu0 %v971_v1  ;;  %v974_v3 = vld [vmem:[#allocation5 + $0x14] ss:$8 sps:$4 sm:$0xff]   ;;  %v976_v4 = vld [vmem:[#allocation5 + $0x10] ss:$8 sps:$4 sm:$0xff]  }
  0x6e   : > { %390 = vmatpush1.bf16.msra.mxu0 %v973_v2  ;;  %v977_v5 = vld [vmem:[#allocation5 + $0x24] ss:$8 sps:$4 sm:$0xff]   ;;  %v979_v6 = vld [vmem:[#allocation5 + $0x20] ss:$8 sps:$4 sm:$0xff]   ;;  %v980_v7 = vld [vmem:[#allocation5 + $0x34] ss:$8 sps:$4 sm:$0xff]  }
  0x6f   : > { %391 = vmatprep.subr.bf16.mxu0 %v974_v3  ;;  %v982_v8 = vld [vmem:[#allocation5 + $0x30] ss:$8 sps:$4 sm:$0xff]   ;;  %v983_v9 = vld [vmem:[#allocation5 + $0x44] ss:$8 sps:$4 sm:$0xff]   ;;  %v985_v10 = vld [vmem:[#allocation5 + $0x40] ss:$8 sps:$4 sm:$0xff]  }
  0x70   : > { %v986_v11 = vld [vmem:[#allocation5 + $0x54] ss:$8 sps:$4 sm:$0xff]   ;;  %v988_v12 = vld [vmem:[#allocation5 + $0x50] ss:$8 sps:$4 sm:$0xff]   ;;  %v989_v13 = vld [vmem:[#allocation5 + $0x64] ss:$8 sps:$4 sm:$0xff]  }
  0x71   : > { %v991_v14 = vld [vmem:[#allocation5 + $0x60] ss:$8 sps:$4 sm:$0xff]   ;;  %v992_v15 = vld [vmem:[#allocation5 + $0x74] ss:$8 sps:$4 sm:$0xff]   ;;  %v994_v16 = vld [vmem:[#allocation5 + $0x70] ss:$8 sps:$4 sm:$0xff]  }
  0x72   : > { %392 = vmatpush1.bf16.msra.mxu0 %v976_v4  ;;  %v1413_v17 = vld [vmem:[%s1402_s14] sm:$0xff]  ;;  %v1416_v18 = vld [vmem:[%s1402_s14 + $0x8] sm:$0xff]  ;;  %v1424_v21 = vld [vmem:[%s1402_s14 + $0x18] sm:$0xff]  ;;  %v300_v40 = vshrl.u32 %v299_v39, 7  ;;  %s271_s28 = scalar_lea.vmem [#allocation8], %s825_s6  ;;  %s868_s17 = sshll.u32 %s1247_s22, 9 }
  0x73   : > { %393 = vmatprep.subr.bf16.mxu0 %v977_v5  ;;  %v279_v19 = vpack.c.bf16 %v1416_v18, %v1413_v17  ;;  %v280_v22 = vpack.c.bf16 %v1424_v21, %v1421_v20  ;;  %v995_v23 = vld [vmem:[#allocation7 + $0x40] sm:$0xff]   ;;  %v997_v25 = vld [vmem:[#allocation7 + $0x48] sm:$0xff]   ;;  %v999_v27 = vld [vmem:[#allocation7 + $0x50] sm:$0xff]   ;;  %s724_s13 = sshll.u32 %s271_s28, 4  ;;  %s1487_s12 = scalar_lea.hbm %s1536_s5, %s868_s17  ;;  %s1481_s13 = int_to_ptr.vmem [resolvable:$true] %s724_s13 }
  0x74   : > { %v996_v24 = vld [vmem:[#allocation7] sm:$0xff]   ;;  %869 = vmatprep.subr.bf16.mxu1 %v995_v23  ;;  %v998_v26 = vld [vmem:[#allocation7 + $0x8] sm:$0xff]   ;;  %v1000_v28 = vld [vmem:[#allocation7 + $0x10] sm:$0xff]   ;;  %v301_v41 = vsub.s32 0, %v300_v40  ;;  %v305_v43 = vsub.s32 1, %v300_v40  ;;  %s711_s30 = scalar_lea.sflag [#allocation4], %s1396_s27 }
  0x75   : > { %870 = vmatpush3.bf16.msra.mxu1 %v996_v24  ;;  %v1001_v29 = vld [vmem:[#allocation7 + $0x58] sm:$0xff]   ;;  %v1003_v31 = vld [vmem:[#allocation7 + $0x60] sm:$0xff]   ;;  %v1005_v33 = vld [vmem:[#allocation7 + $0x68] sm:$0xff]   ;;  %s1113_s9 = scalar_lea.vmem %s1481_s13, 512  ;;  %s1193_s22 = smov [#allocation8]  }
  0x76   : > { %394 = vmatpush1.bf16.msra.mxu0 %v979_v6  ;;  %871 = vmatprep.subr.bf16.mxu1 %v997_v25  ;;  %v1002_v30 = vld [vmem:[#allocation7 + $0x18] sm:$0xff]   ;;  %v1004_v32 = vld [vmem:[#allocation7 + $0x20] sm:$0xff]   ;;  %v1006_v34 = vld [vmem:[#allocation7 + $0x28] sm:$0xff]   ;;  %p1114_p2 = scmp.ne.s32.totalorder %s1481_s13, %s1113_s9  ;;  %s1117_s6 = sshll.u32 %s1193_s22, 4  ;;  %s1118_s6 = int_to_ptr.vmem [resolvable:$false] %s1117_s6 }
  0x77   : > { %395 = vmatprep.subr.bf16.mxu0 %v980_v7  ;;  %v1007_v35 = vld [vmem:[#allocation7 + $0x70] sm:$0xff]   ;;  %v1009_v37 = vld [vmem:[#allocation7 + $0x78] sm:$0xff]   ;;  %v297_v42 = vld [vmem:[%s1533_s2] sm:$0x3]  ;;  %s1119_s10 = scalar_lea.vmem %s1118_s6, 1024  ;;  %p1120_p11 = scmp.lt.s32.totalorder %s1481_s13, %s1118_s6 }
  0x78   : > { %v1008_v36 = vld [vmem:[#allocation7 + $0x30] sm:$0xff]   ;;  %v1010_v38 = vld [vmem:[#allocation7 + $0x38] sm:$0xff]   ;;  %v302_v44 = vrot.slane %v297_v42, %v301_v41  ;;  %v306_v45 = vrot.slane %v297_v42, %v305_v43  ;;  %p1115_p4 = pnand %p1114_p2, %p1344_p8  ;;  %p1121_p13 = scmp.lt.s32.totalorder %s1119_s10, %s1113_s9 }
  0x79   : > { %872 = vmatpush3.bf16.msra.mxu1 %v998_v26 }
  0x7a   : > { %396 = vmatpush1.bf16.msra.mxu0 %v982_v8  ;;  %873 = vmatprep.subr.bf16.mxu1 %v999_v27  ;;  %p1116_p6 = pneg %p1115_p4  ;;  %p1122_p3 = por %p1121_p13, %p1120_p11 }
  0x7b   : > { %397 = vmatprep.subr.bf16.mxu0 %v983_v9 }
  0x7c   : > { %p1123_p7 = pnand %p1122_p3, %p1116_p6 }
  0x7d   : > { %874 = vmatpush3.bf16.msra.mxu1 %v1000_v28 }
  0x7e   : > { %398 = vmatpush1.bf16.msra.mxu0 %v985_v10  ;;  %875 = vmatprep.subr.bf16.mxu1 %v1001_v29 }
  0x7f   : > { %399 = vmatprep.subr.bf16.mxu0 %v986_v11 }
  0x81   : > { %876 = vmatpush3.bf16.msra.mxu1 %v1002_v30 }
  0x82   : > { %400 = vmatpush1.bf16.msra.mxu0 %v988_v12  ;;  %877 = vmatprep.subr.bf16.mxu1 %v1003_v31 }
  0x83   : > { %401 = vmatprep.subr.bf16.mxu0 %v989_v13 }
  0x85   : > { %878 = vmatpush3.bf16.msra.mxu1 %v1004_v32 }
  0x86   : > { %402 = vmatpush1.bf16.msra.mxu0 %v991_v14  ;;  %879 = vmatprep.subr.bf16.mxu1 %v1005_v33 }
  0x87   : > { %403 = vmatprep.subr.bf16.mxu0 %v992_v15 }
  0x89   : > { %880 = vmatpush3.bf16.msra.mxu1 %v1006_v34 }
  0x8a   : > { %404 = vmatpush1.bf16.msra.mxu0 %v994_v16  ;;  %881 = vmatprep.subr.bf16.mxu1 %v1007_v35 }
  0x8d   : > { %422 = vmatmul.mubr.bf16.vlgmr.msra.gmra.mrb[0].mxu0 %v279_v19  ;;  %882 = vmatpush3.bf16.msra.mxu1 %v1008_v36 }
  0x8e   : > { %431 = vmatprep.mubr.bf16.mxu0 %v1192_v0  ;;  %883 = vmatprep.subr.bf16.mxu1 %v1009_v37 }
  0x91   : > { %884 = vmatpush3.bf16.msra.mxu1 %v1010_v38 }
  0x95   : > { %432 = vmatmul.mubr.bf16.gmra.mrb[4].mxu0 %v280_v22 }
 0x160   : > { %v423_v46 = vpop.f32.mrb[0].mxu0 }
 0x161   : > { %v1431_v47 = vadd.f32 %v423_v46, %v302_v44  ;;  %v425_v48 = vpop.f32.mrb[1].mxu0 }
 0x162   : > { %v1433_v49 = vadd.f32 %v425_v48, %v306_v45  ;;  %v427_v50 = vpop.f32.mrb[2].mxu0 }
 0x163   : > { %v450_v51 = vmul.f32 %v1431_v47, %v1431_v47  ;;  %v1437_v52 = vadd.f32 %v427_v50, %v302_v44  ;;  %v429_v53 = vpop.f32.mrb[3].mxu0  ;;  %v442_v50 = vmul.f32 0.5, %v1431_v47 }
 0x164   : > { %v451_v54 = vmul.f32 %v1433_v49, %v1433_v49  ;;  %v1441_v55 = vadd.f32 %v429_v53, %v306_v45 }
 0x165   : > { %v458_v56 = vmul.f32 %v450_v51, %v1431_v47  ;;  %v452_v57 = vmul.f32 %v1437_v52, %v1437_v52  ;;  %v444_v51 = vmul.f32 0.5, %v1437_v52 }
 0x166   : > { %v459_v58 = vmul.f32 %v451_v54, %v1433_v49  ;;  %v453_v59 = vmul.f32 %v1441_v55, %v1441_v55  ;;  %v443_v54 = vmul.f32 0.5, %v1433_v49 }
 0x167   : > { %v466_v60 = vmul.f32 0.044715, %v458_v56  ;;  %v460_v61 = vmul.f32 %v452_v57, %v1437_v52  ;;  %v445_v56 = vmul.f32 0.5, %v1441_v55 }
 0x168   : > { %v467_v62 = vmul.f32 0.044715, %v459_v58  ;;  %v461_v63 = vmul.f32 %v453_v59, %v1441_v55  ;;  %v433_v0 = vpop.f32.mrb[4].mxu0 }
 0x169   : > { %v474_v1 = vadd.f32 %v466_v60, %v1431_v47  ;;  %v468_v2 = vmul.f32 0.044715, %v460_v61  ;;  %v1452_v3 = vadd.f32 %v433_v0, %v302_v44  ;;  %v435_v4 = vpop.f32.mrb[5].mxu0 }
 0x16a   : > { %v469_v5 = vmul.f32 0.044715, %v461_v63  ;;  %v1454_v6 = vadd.f32 %v435_v4, %v306_v45  ;;  %v437_v7 = vpop.f32.mrb[6].mxu0  ;;  %v475_v8 = vadd.f32 %v467_v62, %v1433_v49 }
 0x16b   : > { %v482_v9 = vmul.f32 0.7978846, %v474_v1  ;;  %v476_v10 = vadd.f32 %v468_v2, %v1437_v52  ;;  %v454_v11 = vmul.f32 %v1452_v3, %v1452_v3  ;;  %v438_v12 = vadd.f32 %v437_v7, %v302_v44  ;;  %v439_v13 = vpop.f32.mrb[7].mxu0 }
 0x16c   : > { %v455_v14 = vmul.f32 %v1454_v6, %v1454_v6  ;;  %v440_v15 = vadd.f32 %v439_v13, %v306_v45  ;;  %v477_v16 = vadd.f32 %v469_v5, %v1441_v55  ;;  %v483_v19 = vmul.f32 0.7978846, %v475_v8 }
 0x16d   : > { %1011 = vtanh.f32 %v482_v9  ;;  %v484_v22 = vmul.f32 0.7978846, %v476_v10  ;;  %v462_v23 = vmul.f32 %v454_v11, %v1452_v3  ;;  %v456_v24 = vmul.f32 %v438_v12, %v438_v12 }
 0x16e   : > { %v463_v25 = vmul.f32 %v455_v14, %v1454_v6  ;;  %v457_v26 = vmul.f32 %v440_v15, %v440_v15  ;;  %v485_v27 = vmul.f32 0.7978846, %v477_v16  ;;  %1013 = vtanh.f32 %v483_v19 }
 0x16f   : > { %1015 = vtanh.f32 %v484_v22  ;;  %v470_v28 = vmul.f32 0.044715, %v462_v23  ;;  %v464_v29 = vmul.f32 %v456_v24, %v438_v12  ;;  %v446_v52 = vmul.f32 0.5, %v1452_v3 }
 0x170   : > { %v471_v30 = vmul.f32 0.044715, %v463_v25  ;;  %v465_v31 = vmul.f32 %v457_v26, %v440_v15  ;;  %1017 = vtanh.f32 %v485_v27  ;;  %v448_v49 = vmul.f32 0.5, %v438_v12 }
 0x171   : > { %v478_v32 = vadd.f32 %v470_v28, %v1452_v3  ;;  %v472_v33 = vmul.f32 0.044715, %v464_v29  ;;  %v447_v55 = vmul.f32 0.5, %v1454_v6  ;;  %v449_v8 = vmul.f32 0.5, %v440_v15  ;;  %v845_v3 = vld [vmem:[%s1535_s4] ss:$0 sm:$0xff] }
 0x172   : > { %v479_v34 = vadd.f32 %v471_v30, %v1454_v6  ;;  %v473_v35 = vmul.f32 0.044715, %v465_v31 }
 0x173   : > { %v486_v36 = vmul.f32 0.7978846, %v478_v32  ;;  %v480_v37 = vadd.f32 %v472_v33, %v438_v12 }
 0x174   : > { %v487_v38 = vmul.f32 0.7978846, %v479_v34  ;;  %v481_v39 = vadd.f32 %v473_v35, %v440_v15 }
 0x175   : > { %1019 = vtanh.f32 %v486_v36  ;;  %v488_v40 = vmul.f32 0.7978846, %v480_v37 }
 0x176   : > { %1021 = vtanh.f32 %v487_v38  ;;  %v489_v41 = vmul.f32 0.7978846, %v481_v39 }
 0x177   : > { %v1012_v42 = vpop.eup %1011  ;;  %1023 = vtanh.f32 %v488_v40 }
 0x178   : > { %v1014_v43 = vpop.eup %1013  ;;  %1025 = vtanh.f32 %v489_v41  ;;  %v498_v44 = vadd.f32 1.0, %v1012_v42 }
 0x179   : > { %v1016_v45 = vpop.eup %1015  ;;  %v499_v46 = vadd.f32 1.0, %v1014_v43 }
 0x17a   : > { %v1018_v48 = vpop.eup %1017  ;;  %v500_v53 = vadd.f32 1.0, %v1016_v45  ;;  %v506_v58 = vmul.f32 %v498_v44, %v442_v50 }
 0x17b   : > { %v501_v57 = vadd.f32 1.0, %v1018_v48  ;;  %v507_v60 = vmul.f32 %v499_v46, %v443_v54 }
 0x17c   : > { %v508_v59 = vmul.f32 %v500_v53, %v444_v51 }
 0x17d   : > { %v509_v61 = vmul.f32 %v501_v57, %v445_v56 }
 0x17e   : > { %v514_v62 = vpack.c.bf16 %v508_v59, %v506_v58 }
 0x17f   : > { %v1020_v63 = vpop.eup %1019  ;;  %v515_v0 = vpack.c.bf16 %v509_v61, %v507_v60 }
 0x180   : > { %v1022_v1 = vpop.eup %1021  ;;  %v502_v2 = vadd.f32 1.0, %v1020_v63 }
 0x181   : > { %v1024_v4 = vpop.eup %1023  ;;  %685 = vmatprep.mubr.bf16.mxu1 %v515_v0  ;;  %v503_v47 = vadd.f32 1.0, %v1022_v1 }
 0x182   : > { %v1026_v5 = vpop.eup %1025  ;;  %686 = vmatmul.mubr.bf16.vlgmr.msra.gmra.mrb[0].mxu1 %v514_v62  ;;  %v504_v7 = vadd.f32 1.0, %v1024_v4  ;;  %v510_v10 = vmul.f32 %v502_v2, %v446_v52 }
 0x183   : > { %v505_v9 = vadd.f32 1.0, %v1026_v5  ;;  %v511_v13 = vmul.f32 %v503_v47, %v447_v55 }
 0x184   : > { %v512_v11 = vmul.f32 %v504_v7, %v448_v49 }
 0x185   : > { %v513_v14 = vmul.f32 %v505_v9, %v449_v8 }
 0x186   : > { %v516_v16 = vpack.c.bf16 %v512_v11, %v510_v10 }
 0x187   : > { %v517_v19 = vpack.c.bf16 %v513_v14, %v511_v13 }
 0x189   : > { %693 = vmatprep.mubr.bf16.mxu1 %v517_v19 }
 0x18a   : > { %694 = vmatmul.mubr.bf16.gmra.mrb[4].mxu1 %v516_v16 }
 0x255   : > { %v885_v22 = vpop.f32.mrb[0].mxu1 }
 0x256   : > { %v886_v12 = vpop.f32.mrb[1].mxu1 }
 0x257   : > { %v887_v23 = vadd.f32 %v886_v12, %v885_v22  ;;  %v888_v24 = vpop.f32.mrb[2].mxu1 }
 0x258   : > { %v889_v6 = vpop.f32.mrb[3].mxu1 }
 0x259   : > { %v688_v15 = vadd.f32 %v887_v23, %v845_v3  ;;  %v890_v25 = vadd.f32 %v889_v6, %v888_v24 }
 0x25b   : > { %v702_v26 = vadd.f32 %v688_v15, %v1413_v17  ;;  %v691_v27 = vadd.f32 %v890_v25, %v845_v3 }
 0x25d   : > { %706 = vst [vmem:[%s271_s28] sm:$0xff] %v702_v26  ;;  %v703_v28 = vadd.f32 %v691_v27, %v1416_v18  ;;  %v891_v29 = vpop.f32.mrb[4].mxu1 }
 0x25e   : > { %v892_v30 = vpop.f32.mrb[5].mxu1 }
 0x25f   : > { %707 = vst [vmem:[%s271_s28 + $0x8] sm:$0xff] %v703_v28  ;;  %v893_v31 = vadd.f32 %v892_v30, %v891_v29  ;;  %v894_v32 = vpop.f32.mrb[6].mxu1 }
 0x260   : > { %v895_v33 = vpop.f32.mrb[7].mxu1 }
 0x261   : > { %v696_v34 = vadd.f32 %v893_v31, %v845_v3  ;;  %v896_v35 = vadd.f32 %v895_v33, %v894_v32 }
 0x263   : > { %v704_v17 = vadd.f32 %v696_v34, %v1421_v20  ;;  %v699_v18 = vadd.f32 %v896_v35, %v845_v3 }
 0x265   : > { %708 = vst [vmem:[%s271_s28 + $0x10] sm:$0xff] %v704_v17  ;;  %v705_v36 = vadd.f32 %v699_v18, %v1424_v21 }
 0x267   : > { %709 = vst [vmem:[%s271_s28 + $0x18] sm:$0xff] %v705_v36 }
 0x268   : > { %1126 = shalt.err (!%p1123_p7)
}
 0x269   : > { %s1127_s14 = scalar_lea.hbm %s1487_s12, 512  ;;  %s1131_s15 = scalar_lea.hbm %s1536_s5, 4096 }
 0x26a   : > { %p1128_p9 = scmp.ne.s32.totalorder %s1487_s12, %s1127_s14  ;;  %p1132_p5 = scmp.lt.u32.totalorder %s1487_s12, %s1536_s5 }
 0x26b   : > { %p1133_p10 = scmp.lt.u32.totalorder %s1131_s15, %s1127_s14  ;;  %p1135_p2 = scmp.lt.u32.totalorder %s1127_s14, %s1487_s12 }
 0x26c   : > { %p1129_p12 = pnand %p1128_p9, %p1344_p8 }
 0x26d   : > { %p1134_p1 = por %p1133_p10, %p1132_p5 }
 0x26e   : > { %p1130_p0 = pneg %p1129_p12 }
 0x26f   : > { %p1136_p4 = por %p1135_p2, %p1134_p1 }
 0x271   : > { %p1137_p6 = pnand %p1136_p4, %p1130_p0 }
 0x273   : > { %1140 = shalt.err (!%p1137_p6)
}
 0x274   : > { %s1194_s17 = smov 128   ;;  %s1195_s11 = smov 8  }
 0x275   : > { %907 = dma.vmem_to_hbm [thread:$0]  (%p1344_p8), %s1481_s13, 512, %s1487_s12, %s711_s30, %s1194_s17, %s1194_s17, %s1195_s11  }
 0x276 PF: > { %p929_p11 = scmp.ge.s32.totalorder %s1183_s21, 2  ;;  %s739_s29 = sand.u32 1, %s1171_s18  }
 0x277   : > { %p1551_p13 = scmp.ne.s32.totalorder %s1541_s25, 0  ;;  %s740_s9 = scalar_lea.sflag [#allocation4], %s739_s29 }
 0x279   : > { %p921_p3 = pnand %p929_p11, %p1551_p13 }
 0x27b   : > { %1166 = dma.done.wait (!%p921_p3), %s740_s9, 512  }
 0x27c   : > { %1168 = vsyncadd (!%p921_p3), %s740_s9, 4294966784  ;;  %p19_p7 = scmp.ge.s32.totalorder %s1331_s23, 10   ;;  %s1552_s18 = smov %s1175_s19 }
 0x27d   : > { %s1553_s19 = smov %s1179_s20  ;;  %s1554_s20 = smov %s1340_s7 }
 0x27e   : > { %s1555_s21 = smov %s1331_s23  ;;  %21 = sbr.rel (!%p19_p7) target bundleno = 6 (0x6), region = 93 }
 0x285   :  { %745 = vsyncpa [#allocation3], 1 }
 0x286   :  { %747 = vsyncpa [#allocation3 + $0x1], 1 }
 0x287   :  { %748 = vsyncpa [#allocation6], 1 }
 0x288   :  { %749 = vsyncpa [#allocation4], 1 }
 0x289   :  { %751 = vsyncpa [#allocation4 + $0x1], 1 }

</bundles_post_ra>
